<compile_context>
chip_gen: v5e
topology: v5e:2x2
jax: 0.10.0
libtpu: 0.0.40
codegen_flags: <defaults>
</compile_context>

<pallas_src>
import functools

import jax
import jax.numpy as jnp
from jax import lax
from jax.experimental import pallas as pl
from jax.experimental.pallas import tpu as pltpu


# Contract last dim of x with last dim of y (x @ y^T) without materializing y^T.
_DIMNUMS = (((1,), (1,)), ((), ()))


def _kernel_body(*refs, mode, normalize, inv_t):
    """One (tn, tm) output tile, with the side vectors packed per row/col.

    refs = (x_ref,                # (tn, D)   bf16 (sigmoid) / f32 (gaussian)
            y_ref,                # (tm, D)
            [row_side_ref,        # (tn, nr)  f32: [xsq | rinv]
             col_side_ref,]       # (nc, tm)  f32: [ysq ; cinv]
            o_ref)                # (tn, tm)  f32
    """
    x_ref, y_ref = refs[0], refs[1]
    o_ref = refs[-1]

    s = lax.dot_general(x_ref[...], y_ref[...], dimension_numbers=_DIMNUMS,
                        preferred_element_type=jnp.float32)        # MXU, f32 acc

    if mode == "sigmoid":
        val = jnp.tanh(s)                                           # EUP
        if normalize:
            rs = refs[2][...]                                       # (tn, 1)
            cs = refs[3][...]                                       # (1, tm)
            val = val * rs[:, 0:1] * cs[0:1, :]                     # VPU, no divide
    else:  # gaussian
        rs = refs[2][...]                                           # (tn, 1|2)
        cs = refs[3][...]                                           # (1|2, tm)
        # ||x - y||^2 = ||x||^2 + ||y||^2 - 2 x.y ; row/col norms precomputed.
        d2 = jnp.maximum(rs[:, 0:1] + cs[0:1, :] - 2.0 * s, 0.0)
        val = jnp.exp(-jnp.sqrt(d2) * inv_t)                        # EUP
        if normalize:
            val = val * rs[:, 1:2] * cs[1:2, :]

    o_ref[...] = val.astype(o_ref.dtype)


def _round_up(v, m):
    return -(-v // m) * m


def _vmem_estimate(tn, tm, D, in_itemsize, nr, nc):
    """Rough double-buffered VMEM footprint of one pipeline stage (bytes)."""
    out_b = tn * tm * 4
    in_b = (tn + tm) * D * in_itemsize
    side_b = (tn * nr + nc * tm) * 4
    return 2 * (out_b + in_b + side_b)


def _pick_tiles(N, M, D, in_itemsize, nr, nc,
                want_tn=256, want_tm=1024, budget=20 * 1024 * 1024):
    """Lane-dense tiles: tn multiple of 8, tm multiple of 128, VMEM-bounded."""
    tn = min(want_tn, _round_up(N, 8))
    tm = min(want_tm, _round_up(M, 128))
    # Shrink (keeping 8/128 alignment) if D is large enough to blow the budget.
    while _vmem_estimate(tn, tm, D, in_itemsize, nr, nc) > budget and tm > 128:
        tm = max(128, (tm // 2) // 128 * 128)
    while _vmem_estimate(tn, tm, D, in_itemsize, nr, nc) > budget and tn > 8:
        tn = max(8, (tn // 2) // 8 * 8)
    return tn, tm


def kernel_forward(x, y, *, kernel_mode="sigmoid", ker_norm=True, t=1.0,
                   tn=None, tm=None):
    """Pallas equivalent of Kernel.forward for 2-D inputs x:(N,D), y:(M,D)."""
    if kernel_mode not in ("sigmoid", "gaussian"):
        raise ValueError(f"unknown kernel mode: {kernel_mode}")

    N, D = x.shape
    M, Dy = y.shape
    assert D == Dy
    x = x.astype(jnp.float32)
    y = y.astype(jnp.float32)

    # Number of packed side columns (row_side) / rows (col_side).
    if kernel_mode == "gaussian":
        nr = 2 if ker_norm else 1
    else:
        nr = 1 if ker_norm else 0
    nc = nr

    # MXU operand dtype: bf16 for sigmoid (full MXU rate, half the x/y DMA);
    # f32 for gaussian to keep the d2 expansion accurate for near-duplicates.
    in_dtype = jnp.bfloat16 if kernel_mode == "sigmoid" else jnp.float32
    in_itemsize = jnp.dtype(in_dtype).itemsize

    tn_auto, tm_auto = _pick_tiles(N, M, D, in_itemsize, nr, nc)
    tn = tn_auto if tn is None else tn
    tm = tm_auto if tm is None else tm
    Np = _round_up(N, tn)
    Mp = _round_up(M, tm)

    # ---- Hoisted O(N*D)/O(M*D) side vectors (computed once, f32, unpadded) --
    xsq = ysq = None
    if kernel_mode == "gaussian":
        xsq = jnp.sum(x * x, axis=-1)                               # (N,)
        ysq = jnp.sum(y * y, axis=-1)                               # (M,)

    inv_norm = None
    if ker_norm:
        # diag(mat)[i] depends only on x_i . y_i -> no need to materialize mat.
        # Like the PyTorch module's diagonal()-based normalize, this assumes a
        # square kernel matrix; sqrt of a negative diagonal -> NaN (as in torch).
        assert N == M, "normalization requires a square kernel matrix (N == M)"
        dxy = jnp.sum(x * y, axis=-1)                               # (N,)
        if kernel_mode == "sigmoid":
            diag = jnp.tanh(dxy)
        else:
            diag = jnp.exp(-jnp.sqrt(jnp.maximum(xsq + ysq - 2.0 * dxy, 0.0)) / t)
        inv_norm = lax.rsqrt(diag)                                  # (N,)

    # ---- Pad MXU operands to the tile grid ---------------------------------
    x_in = x.astype(in_dtype)
    y_in = y.astype(in_dtype)
    if Np != N:
        x_in = jnp.pad(x_in, ((0, Np - N), (0, 0)))
    if Mp != M:
        y_in = jnp.pad(y_in, ((0, Mp - M), (0, 0)))

    inputs = [x_in, y_in]
    in_specs = [
        pl.BlockSpec((tn, D), lambda i, j: (i, 0)),
        pl.BlockSpec((tm, D), lambda i, j: (j, 0)),
    ]

    # ---- Pack side vectors: row_side (Np, nr), col_side (nc, Mp) ------------
    row_cols, col_rows = [], []
    if kernel_mode == "gaussian":
        row_cols.append(xsq)
        col_rows.append(ysq)
    if ker_norm:
        row_cols.append(inv_norm)
        col_rows.append(inv_norm)
    if row_cols:
        row_side = jnp.stack(row_cols, axis=-1)                     # (N, nr)
        col_side = jnp.stack(col_rows, axis=0)                      # (nc, M)
        if Np != N:  # pad with 1.0: keeps padded region finite; sliced off below
            row_side = jnp.pad(row_side, ((0, Np - N), (0, 0)), constant_values=1.0)
        if Mp != M:
            col_side = jnp.pad(col_side, ((0, 0), (0, Mp - M)), constant_values=1.0)
        inputs += [row_side, col_side]
        in_specs += [
            pl.BlockSpec((tn, nr), lambda i, j: (i, 0)),
            pl.BlockSpec((nc, tm), lambda i, j: (0, j)),
        ]

    kfn = functools.partial(_kernel_body, mode=kernel_mode, normalize=ker_norm,
                            inv_t=1.0 / float(t))

    # ---- Cost hint + explicit VMEM limit ------------------------------------
    n_trans = 1 if kernel_mode == "sigmoid" else 2
    cost = pl.CostEstimate(
        flops=2 * N * M * D,
        transcendentals=N * M * n_trans,
        bytes_accessed=int((N + M) * D * in_itemsize + N * M * 4
                           + (N * nr + nc * M) * 4))
    vmem_need = _vmem_estimate(tn, tm, D, in_itemsize, nr, nc)
    vmem_limit = int(min(48 * 1024 * 1024, max(2 * vmem_need, 24 * 1024 * 1024)))

    out = pl.pallas_call(
        kfn,
        out_shape=jax.ShapeDtypeStruct((Np, Mp), jnp.float32),
        grid_spec=pltpu.PrefetchScalarGridSpec(
            num_scalar_prefetch=0,
            grid=(Np // tn, Mp // tm),
            in_specs=in_specs,
            out_specs=pl.BlockSpec((tn, tm), lambda i, j: (i, j)),
        ),
        compiler_params=pltpu.CompilerParams(
            dimension_semantics=("parallel", "parallel"),
            vmem_limit_bytes=vmem_limit),
        cost_estimate=cost,
    )(*inputs)

    if Np != N or Mp != M:
        out = out[:N, :M]
    return out


def _reference_forward(x, y, *, kernel_mode, ker_norm, t):
    hp = lax.Precision.HIGHEST
    if kernel_mode == "sigmoid":
        mat = jnp.tanh(jnp.dot(x, y.T, precision=hp))
    else:
        d2 = (jnp.sum(x * x, -1)[:, None] + jnp.sum(y * y, -1)[None, :]
              - 2.0 * jnp.dot(x, y.T, precision=hp))
        mat = jnp.exp(-jnp.sqrt(jnp.maximum(d2, 0.0)) / t)
    if ker_norm:
        norm = jnp.sqrt(jnp.diagonal(mat))
        mat = mat / jnp.outer(norm, norm)
    return mat


if __name__ == "__main__":
    # Module-consistent small shapes: num_node N = 128, hidden_channels D = 32.
    N, D = 128, 32
    key = jax.random.PRNGKey(0)
    kx, ky = jax.random.split(key, 2)
    # Scale keeps tanh out of deep saturation and distances well conditioned.
    x = 0.25 * jax.random.normal(kx, (N, D), dtype=jnp.float32)
    y = 0.25 * jax.random.normal(ky, (N, D), dtype=jnp.float32)

    # 1) sigmoid + normalization, self-kernel: diag = tanh(||x_i||^2) > 0.
    out = jax.block_until_ready(
        kernel_forward(x, x, kernel_mode="sigmoid", ker_norm=True))
    ref = _reference_forward(x, x, kernel_mode="sigmoid", ker_norm=True, t=1.0)
    assert bool(jnp.all(jnp.isfinite(out)))
    assert jnp.allclose(out, ref, atol=2e-2, rtol=2e-2)

    # 2) sigmoid, no normalization, x vs y.
    out = jax.block_until_ready(
        kernel_forward(x, y, kernel_mode="sigmoid", ker_norm=False))
    ref = _reference_forward(x, y, kernel_mode="sigmoid", ker_norm=False, t=1.0)
    assert jnp.allclose(out, ref, atol=2e-2, rtol=2e-2)

    # 3) gaussian, no normalization, x vs y, t = 2.0.
    out = jax.block_until_ready(
        kernel_forward(x, y, kernel_mode="gaussian", ker_norm=False, t=2.0))
    ref = _reference_forward(x, y, kernel_mode="gaussian", ker_norm=False, t=2.0)
    assert jnp.allclose(out, ref, atol=2e-2, rtol=2e-2)

    # 4) gaussian + normalization, self-kernel (diag == 1).  Loose tolerance:
    #    near-zero self-distances are ill-conditioned under the expansion.
    out = jax.block_until_ready(
        kernel_forward(x, x, kernel_mode="gaussian", ker_norm=True, t=2.0))
    ref = _reference_forward(x, x, kernel_mode="gaussian", ker_norm=True, t=2.0)
    assert bool(jnp.all(jnp.isfinite(out)))
    assert jnp.allclose(out, ref, atol=5e-2, rtol=5e-2)

    # 5) Non-128-friendly shapes exercise the padding path (tn mult of 8,
    #    tm mult of 128, output sliced back to (Nr, Mr)).
    Nr, Mr = 200, 272
    kx2, ky2 = jax.random.split(jax.random.PRNGKey(1), 2)
    xr = 0.25 * jax.random.normal(kx2, (Nr, D), dtype=jnp.float32)
    yr = 0.25 * jax.random.normal(ky2, (Mr, D), dtype=jnp.float32)
    out = jax.block_until_ready(
        kernel_forward(xr, yr, kernel_mode="gaussian", ker_norm=False, t=2.0))
    ref = _reference_forward(xr, yr, kernel_mode="gaussian", ker_norm=False, t=2.0)
    assert out.shape == (Nr, Mr)
    assert jnp.allclose(out, ref, atol=2e-2, rtol=2e-2)
    out = jax.block_until_ready(
        kernel_forward(xr, yr, kernel_mode="sigmoid", ker_norm=False))
    ref = _reference_forward(xr, yr, kernel_mode="sigmoid", ker_norm=False, t=1.0)
    assert jnp.allclose(out, ref, atol=2e-2, rtol=2e-2)

    print("KERNEL_OK")
</pallas_src>

<mosaic_0001>
module attributes {stable_mosaic.version = 11 : i64} {
  func.func @_kernel_body(%arg0: i32, %arg1: i32, %arg2: memref<128x32xbf16, #tpu.memory_space<vmem>>, %arg3: memref<128x32xbf16, #tpu.memory_space<vmem>>, %arg4: memref<128x1xf32, #tpu.memory_space<vmem>>, %arg5: memref<1x128xf32, #tpu.memory_space<vmem>>, %arg6: memref<128x128xf32, #tpu.memory_space<vmem>>) attributes {dimension_semantics = [#tpu.dimension_semantics<parallel>, #tpu.dimension_semantics<parallel>], iteration_bounds = array<i64: 1, 1>, scalar_prefetch = 0 : i64, scratch_operands = 0 : i64, tpu.core_type = #tpu.core_type<tc>, window_params = [{transform_indices = @transform_0, window_bounds = array<i64: 128, 32>}, {transform_indices = @transform_1, window_bounds = array<i64: 128, 32>}, {transform_indices = @transform_2, window_bounds = array<i64: 128, 1>}, {transform_indices = @transform_3, window_bounds = array<i64: 1, 128>}, {transform_indices = @transform_4, window_bounds = array<i64: 128, 128>}]} {
    %c0 = arith.constant 0 : index
    %c0_0 = arith.constant 0 : index
    %0 = vector.load %arg2[%c0, %c0_0] : memref<128x32xbf16, #tpu.memory_space<vmem>>, vector<128x32xbf16>
    %c0_1 = arith.constant 0 : index
    %c0_2 = arith.constant 0 : index
    %1 = vector.load %arg3[%c0_1, %c0_2] : memref<128x32xbf16, #tpu.memory_space<vmem>>, vector<128x32xbf16>
    %cst = arith.constant dense<0.000000e+00> : vector<128x128xf32>
    %2 = tpu.matmul %0, %1, %cst {dimension_numbers = #tpu.dot_dimension_numbers<[1], [1], [0], [0], [0, 0, 1, 0], [], []>} : vector<128x32xbf16>, vector<128x32xbf16>, vector<128x128xf32> -> vector<128x128xf32>
    %3 = math.tanh %2 : vector<128x128xf32>
    %c0_3 = arith.constant 0 : index
    %c0_4 = arith.constant 0 : index
    %4 = vector.load %arg4[%c0_3, %c0_4] : memref<128x1xf32, #tpu.memory_space<vmem>>, vector<128x1xf32>
    %c0_5 = arith.constant 0 : index
    %c0_6 = arith.constant 0 : index
    %5 = vector.load %arg5[%c0_5, %c0_6] : memref<1x128xf32, #tpu.memory_space<vmem>>, vector<1x128xf32>
    %6 = vector.broadcast %4 : vector<128x1xf32> to vector<128x128xf32>
    %7 = arith.mulf %3, %6 : vector<128x128xf32>
    %8 = vector.broadcast %5 : vector<1x128xf32> to vector<128x128xf32>
    %9 = arith.mulf %7, %8 : vector<128x128xf32>
    %c0_7 = arith.constant 0 : index
    %c0_8 = arith.constant 0 : index
    %10 = vector.load %arg6[%c0_7, %c0_8] : memref<128x128xf32, #tpu.memory_space<vmem>>, vector<128x128xf32>
    tpu.vector_store %arg6[%c0_7, %c0_8], %9 {strides = array<i32>} : memref<128x128xf32, #tpu.memory_space<vmem>>, vector<128x128xf32>,
    return
  }
  func.func @transform_0(%arg0: i32, %arg1: i32) -> (i32, i32) {
    %c0_i32 = arith.constant 0 : i32
    %c0_i32_0 = arith.constant 0 : i32
    return %arg0, %c0_i32 : i32, i32
  }
  func.func @transform_1(%arg0: i32, %arg1: i32) -> (i32, i32) {
    %c0_i32 = arith.constant 0 : i32
    %c0_i32_0 = arith.constant 0 : i32
    return %arg1, %c0_i32 : i32, i32
  }
  func.func @transform_2(%arg0: i32, %arg1: i32) -> (i32, i32) {
    %c0_i32 = arith.constant 0 : i32
    %c0_i32_0 = arith.constant 0 : i32
    return %arg0, %c0_i32 : i32, i32
  }
  func.func @transform_3(%arg0: i32, %arg1: i32) -> (i32, i32) {
    %c0_i32 = arith.constant 0 : i32
    %c0_i32_0 = arith.constant 0 : i32
    return %c0_i32, %arg1 : i32, i32
  }
  func.func @transform_4(%arg0: i32, %arg1: i32) -> (i32, i32) {
    %c0_i32 = arith.constant 0 : i32
    return %arg0, %arg1 : i32, i32
  }
}

</mosaic_0001>

<bundles_post_ra>
// kernel: tpu_custom_call.1
= control target key start
LH: loop header
LB: loop body
LE: loop exit
PB: predicated region body
PF: predicated region fallthrough
CT: control target
= control target key end

     0   :  { %vm130_vm0 = vcmask 261120   ;;  %v588_v1 = vmov 0   ;;  %s765_s0 = inlined_call_operand.vmem [shape: bf16[128,32], index: 0, kind: input, shape index: {}]   ;;  %s766_s1 = inlined_call_operand.vmem [shape: bf16[128,32], index: 1, kind: input, shape index: {}]   ;;  %s767_s2 = inlined_call_operand.vmem [shape: f32[128,1], index: 2, kind: input, shape index: {}]   ;;  %s768_s3 = inlined_call_operand.vmem [shape: f32[1,128], index: 3, kind: input, shape index: {}]   ;;  %s769_s4 = inlined_call_operand.hbm [shape: f32[128,128], index: 4, kind: output, shape index: {}]  }
   0x1   :  { %v497_v0 = vld [vmem:[%s766_s1 + $0x38] sm:$0xff]  ;;  %526 = vset.pattern.permute.xlu0 %v588_v1  ;;  %v244_v2 = vld [vmem:[%s767_s2] sm:$0xff]  ;;  %527 = vset.pattern.permute.xlu1 %v588_v1 }
   0x2   :  { %v177_v3 = vsel %vm130_vm0, %v497_v0, 0  ;;  %263 = vperm.xlu0 %526, %v244_v2   ;;  %528 = vset.pattern.permute.xlu2 %v588_v1 }
   0x3   :  { %179 = vmatpush.bf16.xpose.msra.mxu0 %v177_v3  ;;  %498 = vmatpush.bf16.xpose.msra.mxu1 %v177_v3 }
   0x4   :  { %9 = vsyncpa [#allocation3], 0  ;;  %499 = vmatpush.bf16.xpose.msra.mxu2 %v177_v3  ;;  %500 = vmatpush.bf16.xpose.msra.mxu3 %v177_v3  ;;  %v496_v4 = vld [vmem:[%s766_s1 + $0x30] sm:$0xff]  ;;  %v245_v5 = vld [vmem:[%s767_s2 + $0x8] sm:$0xff]  ;;  %s398_s29 = sshll.u32 %s769_s4, 4  ;;  %s590_s30 = smov 128   ;;  %s399_s29 = int_to_ptr.hbm [resolvable:$true] %s398_s29 }
   0x5   :  { %v174_v6 = vsel %vm130_vm0, %v496_v4, 0  ;;  %v495_v7 = vld [vmem:[%s766_s1 + $0x28] sm:$0xff]  ;;  %v246_v8 = vld [vmem:[%s767_s2 + $0x10] sm:$0xff]  ;;  %v494_v11 = vld [vmem:[%s766_s1 + $0x20] sm:$0xff]  ;;  %s591_s5 = smov 8  }
   0x6   :  { %273 = vperm.xlu1 %527, %v246_v8   ;;  %v250_v9 = vld [vmem:[%s767_s2 + $0x30] sm:$0xff]  ;;  %v171_v10 = vsel %vm130_vm0, %v495_v7, 0  ;;  %v247_v12 = vld [vmem:[%s767_s2 + $0x18] sm:$0xff]  ;;  %v253_v13 = vld [vmem:[%s767_s2 + $0x48] sm:$0xff]  ;;  %v168_v14 = vsel %vm130_vm0, %v494_v11, 0 }
   0x7   :  { %v493_v15 = vld [vmem:[%s766_s1 + $0x18] sm:$0xff]  ;;  %v256_v17 = vld [vmem:[%s767_s2 + $0x60] sm:$0xff]  ;;  %v254_v20 = vld [vmem:[%s767_s2 + $0x50] sm:$0xff] }
   0x8   :  { %v251_v16 = vld [vmem:[%s767_s2 + $0x38] sm:$0xff]  ;;  %v165_v18 = vsel %vm130_vm0, %v493_v15, 0  ;;  %v248_v19 = vld [vmem:[%s767_s2 + $0x20] sm:$0xff]  ;;  %v492_v21 = vld [vmem:[%s766_s1 + $0x10] sm:$0xff] }
   0x9   :  { %283 = vperm.xlu2 %528, %v248_v19   ;;  %v259_v22 = vld [vmem:[%s767_s2 + $0x78] sm:$0xff]  ;;  %v162_v23 = vsel %vm130_vm0, %v492_v21, 0  ;;  %v249_v24 = vld [vmem:[%s767_s2 + $0x28] sm:$0xff]  ;;  %v252_v28 = vld [vmem:[%s767_s2 + $0x40] sm:$0xff] }
   0xa   :  { %268 = vperm.xlu0 %526, %v245_v5   ;;  %v257_v25 = vld [vmem:[%s767_s2 + $0x68] sm:$0xff]  ;;  %v490_v29 = vld [vmem:[%s766_s1] sm:$0xff]  ;;  %v255_v31 = vld [vmem:[%s767_s2 + $0x58] sm:$0xff] }
   0xb   :  { %180 = vmatpush.bf16.xpose.msra.mxu0 %v174_v6  ;;  %501 = vmatpush.bf16.xpose.msra.mxu1 %v174_v6  ;;  %v491_v26 = vld [vmem:[%s766_s1 + $0x8] sm:$0xff]  ;;  %v156_v30 = vsel %vm130_vm0, %v490_v29, 0  ;;  %v482_v32 = vld [vmem:[%s765_s0] sm:$0xff]  ;;  %v484_v33 = vld [vmem:[%s765_s0 + $0x10] sm:$0xff] }
   0xc   :  { %502 = vmatpush.bf16.xpose.msra.mxu2 %v174_v6  ;;  %503 = vmatpush.bf16.xpose.msra.mxu3 %v174_v6  ;;  %v159_v27 = vsel %vm130_vm0, %v491_v26, 0  ;;  %v486_v34 = vld [vmem:[%s765_s0 + $0x20] sm:$0xff]  ;;  %v488_v35 = vld [vmem:[%s765_s0 + $0x30] sm:$0xff]  ;;  %v483_v37 = vld [vmem:[%s765_s0 + $0x8] sm:$0xff] }
   0xd   :  { %v258_v36 = vld [vmem:[%s767_s2 + $0x70] sm:$0xff]  ;;  %v485_v38 = vld [vmem:[%s765_s0 + $0x18] sm:$0xff]  ;;  %v487_v39 = vld [vmem:[%s765_s0 + $0x28] sm:$0xff] }
   0xe   :  { %278 = vperm.xlu1 %527, %v247_v12   ;;  %v489_v40 = vld [vmem:[%s765_s0 + $0x38] sm:$0xff]  ;;  %v740_v52 = vld [vmem:[%s768_s3] ss:$0 sm:$0xff]  ;;  %s589_s3 = smov [#allocation2]  }
   0xf   :  { %s396_s26 = sshll.u32 %s589_s3, 4  ;;  %s397_s26 = int_to_ptr.vmem [resolvable:$true] %s396_s26 }
  0x11   :  { %288 = vperm.xlu2 %528, %v249_v24  }
  0x12   :  { %293 = vperm.xlu0 %526, %v250_v9  }
  0x13   :  { %181 = vmatpush.bf16.xpose.msra.mxu0 %v171_v10  ;;  %504 = vmatpush.bf16.xpose.msra.mxu1 %v171_v10 }
  0x14   :  { %505 = vmatpush.bf16.xpose.msra.mxu2 %v171_v10  ;;  %506 = vmatpush.bf16.xpose.msra.mxu3 %v171_v10 }
  0x16   :  { %298 = vperm.xlu1 %527, %v251_v16  }
  0x19   :  { %303 = vperm.xlu2 %528, %v252_v28  }
  0x1a   :  { %308 = vperm.xlu0 %526, %v253_v13  }
  0x1b   :  { %182 = vmatpush.bf16.xpose.msra.mxu0 %v168_v14  ;;  %507 = vmatpush.bf16.xpose.msra.mxu1 %v168_v14 }
  0x1c   :  { %508 = vmatpush.bf16.xpose.msra.mxu2 %v168_v14  ;;  %509 = vmatpush.bf16.xpose.msra.mxu3 %v168_v14 }
  0x1e   :  { %313 = vperm.xlu1 %527, %v254_v20  }
  0x21   :  { %318 = vperm.xlu2 %528, %v255_v31  }
  0x22   :  { %323 = vperm.xlu0 %526, %v256_v17  }
  0x23   :  { %183 = vmatpush.bf16.xpose.msra.mxu0 %v165_v18  ;;  %510 = vmatpush.bf16.xpose.msra.mxu1 %v165_v18 }
  0x24   :  { %511 = vmatpush.bf16.xpose.msra.mxu2 %v165_v18  ;;  %512 = vmatpush.bf16.xpose.msra.mxu3 %v165_v18 }
  0x26   :  { %328 = vperm.xlu1 %527, %v257_v25  }
  0x29   :  { %333 = vperm.xlu2 %528, %v258_v36  }
  0x2a   :  { %338 = vperm.xlu0 %526, %v259_v22  }
  0x2b   :  { %184 = vmatpush.bf16.xpose.msra.mxu0 %v162_v23  ;;  %513 = vmatpush.bf16.xpose.msra.mxu1 %v162_v23 }
  0x2c   :  { %514 = vmatpush.bf16.xpose.msra.mxu2 %v162_v23  ;;  %515 = vmatpush.bf16.xpose.msra.mxu3 %v162_v23 }
  0x33   :  { %185 = vmatpush.bf16.xpose.msra.mxu0 %v159_v27  ;;  %516 = vmatpush.bf16.xpose.msra.mxu1 %v159_v27 }
  0x34   :  { %517 = vmatpush.bf16.xpose.msra.mxu2 %v159_v27  ;;  %518 = vmatpush.bf16.xpose.msra.mxu3 %v159_v27 }
  0x3b   :  { %186 = vmatpush.bf16.xpose.msra.mxu0 %v156_v30  ;;  %519 = vmatpush.bf16.xpose.msra.mxu1 %v156_v30 }
  0x3c   :  { %520 = vmatpush.bf16.xpose.msra.mxu2 %v156_v30  ;;  %521 = vmatpush.bf16.xpose.msra.mxu3 %v156_v30 }
  0x42   :  { %474 = vmatmul.msk.bf16.vlgmr.msra.gmra.mxu0 %vm130_vm0, %v482_v32  ;;  %476 = vmatmul.msk.bf16.vlgmr.msra.gmra.mxu1 %vm130_vm0, %v484_v33 }
  0x43   :  { %478 = vmatmul.msk.bf16.vlgmr.msra.gmra.mxu2 %vm130_vm0, %v486_v34  ;;  %480 = vmatmul.msk.bf16.vlgmr.msra.gmra.mxu3 %vm130_vm0, %v488_v35 }
  0x52   :  { %475 = vmatmul.msk.bf16.gmra.mxu0 %vm130_vm0, %v483_v37  ;;  %477 = vmatmul.msk.bf16.gmra.mxu1 %vm130_vm0, %v485_v38 }
  0x53   :  { %479 = vmatmul.msk.bf16.gmra.mxu2 %vm130_vm0, %v487_v39  ;;  %481 = vmatmul.msk.bf16.gmra.mxu3 %vm130_vm0, %v489_v40 }
  0x63   :  { %v284_v44 = vpop.permute.xlu2 %283 }
  0x6b   :  { %v289_v47 = vpop.permute.xlu2 %288 }
  0x73   :  { %v304_v61 = vpop.permute.xlu2 %303 }
  0x74   :  { %v264_v41 = vpop.permute.xlu0 %263 }
  0x78   :  { %v729_v42 = vpop.permute.xlu1 %273 }
  0x7b   :  { %v319_v17 = vpop.permute.xlu2 %318 }
  0x7c   :  { %v269_v43 = vpop.permute.xlu0 %268 }
  0x80   :  { %v731_v45 = vpop.permute.xlu1 %278 }
  0x83   :  { %v334_v37 = vpop.permute.xlu2 %333 }
  0x84   :  { %v733_v46 = vpop.permute.xlu0 %293 }
  0x88   :  { %v735_v50 = vpop.permute.xlu1 %298 }
  0x8c   :  { %v309_v51 = vpop.permute.xlu0 %308 }
  0x90   :  { %v314_v0 = vpop.permute.xlu1 %313 }
  0x94   :  { %v324_v2 = vpop.permute.xlu0 %323 }
  0x98   :  { %v329_v20 = vpop.permute.xlu1 %328 }
  0xbf   :  { %v188_v48 = vpop.f32.mrf.mxu0  ;;  %v198_v49 = vpop.f32.mrf.mxu1 }
  0xc0   :  { %530 = vtanh.f32 %v188_v48 }
  0xc1   :  { %532 = vtanh.f32 %v198_v49 }
  0xc6   :  { %v531_v53 = vpop.eup %530  ;;  %v208_v54 = vpop.f32.mrf.mxu2 }
  0xc7   :  { %v218_v55 = vpop.f32.mrf.mxu3  ;;  %v533_v56 = vpop.eup %532  ;;  %v341_v57 = vmul.f32 %v531_v53, %v264_v41  ;;  %534 = vtanh.f32 %v208_v54 }
  0xc8   :  { %v190_v58 = vpop.f32.mrf.mxu0  ;;  %v200_v59 = vpop.f32.mrf.mxu1  ;;  %v345_v60 = vmul.f32 %v533_v56, %v284_v44  ;;  %536 = vtanh.f32 %v218_v55 }
  0xc9   :  { %v360_v62 = vmul.f32 %v740_v52, %v341_v57  ;;  %538 = vtanh.f32 %v190_v58  ;;  %v339_v55 = vpop.permute.xlu0 %338 }
  0xca   :  { %v364_v63 = vmul.f32 %v740_v52, %v345_v60  ;;  %540 = vtanh.f32 %v200_v59 }
  0xcb   :  { %376 = vst [vmem:[#allocation2] sm:$0xff] %v360_v62 }
  0xcc   :  { %380 = vst [vmem:[#allocation2 + $0x20] sm:$0xff] %v364_v63 }
  0xcd   :  { %v535_v1 = vpop.eup %534 }
  0xce   :  { %v537_v3 = vpop.eup %536  ;;  %v349_v4 = vmul.f32 %v535_v1, %v304_v61  ;;  %v210_v5 = vpop.f32.mrf.mxu2 }
  0xcf   :  { %v220_v6 = vpop.f32.mrf.mxu3  ;;  %v539_v7 = vpop.eup %538  ;;  %v353_v8 = vmul.f32 %v537_v3, %v324_v2  ;;  %542 = vtanh.f32 %v210_v5 }
  0xd0   :  { %v193_v9 = vpop.f32.mrf.mxu0  ;;  %v203_v10 = vpop.f32.mrf.mxu1  ;;  %v368_v12 = vmul.f32 %v740_v52, %v349_v4  ;;  %v342_v13 = vmul.f32 %v539_v7, %v269_v43  ;;  %544 = vtanh.f32 %v220_v6 }
  0xd1   :  { %v541_v11 = vpop.eup %540  ;;  %v372_v14 = vmul.f32 %v740_v52, %v353_v8  ;;  %546 = vtanh.f32 %v193_v9 }
  0xd2   :  { %v346_v15 = vmul.f32 %v541_v11, %v289_v47  ;;  %384 = vst [vmem:[#allocation2 + $0x40] sm:$0xff] %v368_v12  ;;  %v361_v16 = vmul.f32 %v740_v52, %v342_v13  ;;  %548 = vtanh.f32 %v203_v10 }
  0xd3   :  { %388 = vst [vmem:[#allocation2 + $0x60] sm:$0xff] %v372_v14 }
  0xd4   :  { %v365_v18 = vmul.f32 %v740_v52, %v346_v15  ;;  %377 = vst [vmem:[#allocation2 + $0x8] sm:$0xff] %v361_v16 }
  0xd5   :  { %v543_v19 = vpop.eup %542 }
  0xd6   :  { %381 = vst [vmem:[#allocation2 + $0x28] sm:$0xff] %v365_v18  ;;  %v545_v21 = vpop.eup %544  ;;  %v350_v22 = vmul.f32 %v543_v19, %v309_v51  ;;  %v213_v23 = vpop.f32.mrf.mxu2 }
  0xd7   :  { %v223_v24 = vpop.f32.mrf.mxu3  ;;  %v547_v25 = vpop.eup %546  ;;  %v354_v26 = vmul.f32 %v545_v21, %v329_v20  ;;  %550 = vtanh.f32 %v213_v23 }
  0xd8   :  { %v195_v27 = vpop.f32.mrf.mxu0  ;;  %v205_v28 = vpop.f32.mrf.mxu1  ;;  %v369_v30 = vmul.f32 %v740_v52, %v350_v22  ;;  %v343_v31 = vmul.f32 %v547_v25, %v729_v42  ;;  %552 = vtanh.f32 %v223_v24 }
  0xd9   :  { %v549_v29 = vpop.eup %548  ;;  %v373_v32 = vmul.f32 %v740_v52, %v354_v26  ;;  %554 = vtanh.f32 %v195_v27 }
  0xda   :  { %v347_v33 = vmul.f32 %v549_v29, %v733_v46  ;;  %385 = vst [vmem:[#allocation2 + $0x48] sm:$0xff] %v369_v30  ;;  %v362_v34 = vmul.f32 %v740_v52, %v343_v31  ;;  %556 = vtanh.f32 %v205_v28 }
  0xdb   :  { %389 = vst [vmem:[#allocation2 + $0x68] sm:$0xff] %v373_v32 }
  0xdc   :  { %v366_v35 = vmul.f32 %v740_v52, %v347_v33  ;;  %378 = vst [vmem:[#allocation2 + $0x10] sm:$0xff] %v362_v34 }
  0xdd   :  { %v551_v36 = vpop.eup %550 }
  0xde   :  { %382 = vst [vmem:[#allocation2 + $0x30] sm:$0xff] %v366_v35  ;;  %v553_v38 = vpop.eup %552  ;;  %v351_v39 = vmul.f32 %v551_v36, %v314_v0  ;;  %v215_v40 = vpop.f32.mrf.mxu2 }
  0xdf   :  { %v225_v41 = vpop.f32.mrf.mxu3  ;;  %v555_v42 = vpop.eup %554  ;;  %v355_v43 = vmul.f32 %v553_v38, %v334_v37  ;;  %558 = vtanh.f32 %v215_v40 }
  0xe0   :  { %v557_v44 = vpop.eup %556  ;;  %v370_v46 = vmul.f32 %v740_v52, %v351_v39  ;;  %v344_v47 = vmul.f32 %v555_v42, %v731_v45  ;;  %560 = vtanh.f32 %v225_v41 }
  0xe1   :  { %v374_v48 = vmul.f32 %v740_v52, %v355_v43  ;;  %v348_v49 = vmul.f32 %v557_v44, %v735_v50 }
  0xe2   :  { %386 = vst [vmem:[#allocation2 + $0x50] sm:$0xff] %v370_v46  ;;  %v363_v51 = vmul.f32 %v740_v52, %v344_v47 }
  0xe3   :  { %390 = vst [vmem:[#allocation2 + $0x70] sm:$0xff] %v374_v48  ;;  %v367_v53 = vmul.f32 %v740_v52, %v348_v49 }
  0xe4   :  { %379 = vst [vmem:[#allocation2 + $0x18] sm:$0xff] %v363_v51 }
  0xe5   :  { %v559_v54 = vpop.eup %558  ;;  %383 = vst [vmem:[#allocation2 + $0x38] sm:$0xff] %v367_v53 }
  0xe6   :  { %v561_v45 = vpop.eup %560  ;;  %v352_v56 = vmul.f32 %v559_v54, %v319_v17 }
  0xe7   :  { %v356_v57 = vmul.f32 %v561_v45, %v339_v55 }
  0xe8   :  { %v371_v50 = vmul.f32 %v740_v52, %v352_v56 }
  0xe9   :  { %v375_v58 = vmul.f32 %v740_v52, %v356_v57 }
  0xea   :  { %387 = vst [vmem:[#allocation2 + $0x58] sm:$0xff] %v371_v50 }
  0xeb   :  { %391 = vst [vmem:[#allocation2 + $0x78] sm:$0xff] %v375_v58 }
  0xec   :  { %404 = dma.vmem_to_hbm [thread:$0]  %s397_s26, 2048, %s399_s29, [#allocation3], %s590_s30, %s590_s30, %s591_s5  }
  0xed   :  { %586 = dma.done.wait [#allocation3], 2048  }
  0xee   :  { %587 = vsyncadd [#allocation3], 4294965248 }
  0xef   :  { %409 = vsyncpa [#allocation3], 1 }

</bundles_post_ra>
